<compile_context>
chip_gen: v6e
topology: v6e:2x2x1
jax: 0.10.0
libtpu: 0.0.40
codegen_flags: <defaults>
</compile_context>

<pallas_src>
import functools

import jax
import jax.numpy as jnp
from jax.experimental import pallas as pl
from jax.experimental.pallas import tpu as pltpu

_LANE = 128
_SUBLANE = 8


def _round_up(x, m):
    return ((x + m - 1) // m) * m


def _tensorcores_per_chip():
    """Best-effort detection of chips with 2 TensorCores (v7x / v4 / v5p)."""
    try:
        kind = jax.devices()[0].device_kind.lower()
    except Exception:
        return 1
    return 2 if any(t in kind for t in ("v7", "v4", "v5p")) else 1


# ----------------------------- Pallas kernel ------------------------------- #
def _fused_level_k_kernel(max_action, h2,
                          o_ref, w1_ref, whid_ref, w4_ref, b_ref, out_ref):
    """One fused block-diagonal MLP: columns [0:act_dim) are the self policy,
    [act_dim:act_dim+other_dim) the other policy, the rest lane padding."""
    cd = w1_ref.dtype  # bf16 MXU operands; accumulate/VPU math in f32
    x = o_ref[...].astype(cd)

    h = jnp.dot(x, w1_ref[...], preferred_element_type=jnp.float32) + b_ref[0:1, :h2]
    h = jnp.maximum(h, 0.0)
    h = jnp.dot(h.astype(cd), whid_ref[0], preferred_element_type=jnp.float32) + b_ref[1:2, :h2]
    h = jnp.maximum(h, 0.0)
    h = jnp.dot(h.astype(cd), whid_ref[1], preferred_element_type=jnp.float32) + b_ref[2:3, :h2]
    h = jnp.maximum(h, 0.0)
    y = jnp.dot(h.astype(cd), w4_ref[...], preferred_element_type=jnp.float32) + b_ref[3:4, :]

    # Lane-padded final layer (zeros) -> unmasked full-lane store of the whole slab.
    out_ref[...] = (max_action * jnp.tanh(y)).astype(out_ref.dtype)


# ------------------------------ wrapper ------------------------------------ #
def fused_level_k_policies(o, packed, h2, *, max_action, act_dim, other_dim,
                           tile_b=512, min_tiles=None):
    """One pallas_call -> (self_action (B, act_dim), other_action (B, other_dim))."""
    w1, w_hid, w4, biases = packed
    B, obs_dim = o.shape
    pad_out = w4.shape[1]

    if min_tiles is None:
        min_tiles = _tensorcores_per_chip()

    # Batch tiling: big tiles to amortize per-step overhead; split into >=min_tiles
    # grid steps when the chip has >1 TensorCore so ("parallel",) can use both.
    b8 = _round_up(B, _SUBLANE)
    tile = min(_round_up(tile_b, _SUBLANE), b8)
    if min_tiles > 1 and b8 >= min_tiles * _SUBLANE:
        tile = min(tile, _round_up(pl.cdiv(b8, min_tiles), _SUBLANE))
    tile = max(tile, _SUBLANE)
    b_pad = _round_up(B, tile)
    if b_pad != B:
        o = jnp.pad(o, ((0, b_pad - B), (0, 0)))
    num_tiles = b_pad // tile

    kernel = functools.partial(_fused_level_k_kernel, float(max_action), int(h2))

    # Weights/biases use constant index_maps -> loaded once, VMEM-resident across steps.
    # TODO(synk): pipeline_mode=pl.Buffered(1) on the constant-index weight specs would
    # drop their second pipeline buffer if Mosaic does not already do so.
    out = pl.pallas_call(
        kernel,
        out_shape=jax.ShapeDtypeStruct((b_pad, pad_out), jnp.float32),
        grid_spec=pltpu.PrefetchScalarGridSpec(
            num_scalar_prefetch=0,
            grid=(num_tiles,),
            in_specs=[
                pl.BlockSpec((tile, obs_dim), lambda i: (i, 0)),
                pl.BlockSpec(w1.shape, lambda i: (0, 0)),
                pl.BlockSpec(w_hid.shape, lambda i: (0, 0, 0)),
                pl.BlockSpec(w4.shape, lambda i: (0, 0)),
                pl.BlockSpec(biases.shape, lambda i: (0, 0)),
            ],
            out_specs=pl.BlockSpec((tile, pad_out), lambda i: (i, 0)),
        ),
        compiler_params=pltpu.CompilerParams(
            dimension_semantics=("parallel",)),
    )(o, w1, w_hid, w4, biases)

    self_action = out[:B, :act_dim]
    other_action = out[:B, act_dim:act_dim + other_dim]
    return self_action, other_action


# ------------------------ parameter construction --------------------------- #
def _linear_init(kw, kb, fan_in, fan_out):
    bound = 1.0 / float(fan_in) ** 0.5
    w = jax.random.uniform(kw, (fan_in, fan_out), jnp.float32, -bound, bound)
    b = jax.random.uniform(kb, (fan_out,), jnp.float32, -bound, bound)
    return w, b


def make_mlp_layers(key, obs_dim, out_dim, hidden=64):
    """nn.Linear-style params for fc1/fc2/fc3/action_out (weights stored (in, out))."""
    ks = jax.random.split(key, 8)
    return (_linear_init(ks[0], ks[1], obs_dim, hidden),
            _linear_init(ks[2], ks[3], hidden, hidden),
            _linear_init(ks[4], ks[5], hidden, hidden),
            _linear_init(ks[6], ks[7], hidden, out_dim))


def _block_diag(a, b):
    out = jnp.zeros((a.shape[0] + b.shape[0], a.shape[1] + b.shape[1]), jnp.float32)
    out = out.at[: a.shape[0], : a.shape[1]].set(a)
    out = out.at[a.shape[0]:, a.shape[1]:].set(b)
    return out


def fuse_policies(self_layers, other_layers, *, hidden=64, compute_dtype=jnp.bfloat16):
    """Fuse the self & other policy MLPs into one block-diagonal network and pack
    the parameters into 4 arrays (w1, stacked hidden weights, padded w4, bias slab)."""
    (sw1, sb1), (sw2, sb2), (sw3, sb3), (sw4, sb4) = self_layers
    (ow1, ob1), (ow2, ob2), (ow3, ob3), (ow4, ob4) = other_layers
    h2 = 2 * hidden
    out_dim = sw4.shape[1] + ow4.shape[1]
    pad_out = _round_up(max(out_dim, _LANE), _LANE)

    w1 = jnp.concatenate([sw1, ow1], axis=1)                       # (obs, 128)
    w2 = _block_diag(sw2, ow2)                                      # (128, 128)
    w3 = _block_diag(sw3, ow3)                                      # (128, 128)
    w4 = jnp.pad(_block_diag(sw4, ow4), ((0, 0), (0, pad_out - out_dim)))

    biases = jnp.zeros((4, pad_out), jnp.float32)
    biases = biases.at[0, :h2].set(jnp.concatenate([sb1, ob1]))
    biases = biases.at[1, :h2].set(jnp.concatenate([sb2, ob2]))
    biases = biases.at[2, :h2].set(jnp.concatenate([sb3, ob3]))
    biases = biases.at[3, :out_dim].set(jnp.concatenate([sb4, ob4]))

    w_hid = jnp.stack([w2, w3])                                     # (2, 128, 128)
    packed = (w1.astype(compute_dtype), w_hid.astype(compute_dtype),
              w4.astype(compute_dtype), biases)
    return packed, h2


# ----------------------------- Level-K actor -------------------------------- #
class LevelKActorPallas:
    def __init__(self, *, obs_dim, act_dim, level_k, n_agents, max_action, key):
        self.obs_dim = obs_dim
        self.act_dim = act_dim
        self.other_dim = act_dim * (n_agents - 1)
        self.level_k = level_k
        self.n_agents = n_agents
        self.max_action = max_action
        self.boot_dim = act_dim if level_k % 2 == 0 else self.other_dim
        k_self, k_other = jax.random.split(key)
        # Self policy = this module's fc1/fc2/fc3/action_out; other policy = the
        # inferred opponents' head (act_dim * (n_agents - 1) outputs).
        self.self_layers = make_mlp_layers(k_self, obs_dim, act_dim)
        self.other_layers = make_mlp_layers(k_other, obs_dim, self.other_dim)
        self.packed, self.h2 = fuse_policies(self.self_layers, self.other_layers)

    def forward(self, o, rand_key):
        # TODO(synk): infer_self_policy / infer_other_policy are external callables in the
        # PyTorch module; per the PR2-MPE actor convention they condition on `o` only, so
        # the two policy evaluations are deduplicated into one fused pass. Remove the dedup
        # if the real callables concatenate the previously inferred action into their input.
        self_action, other_action = fused_level_k_policies(
            o, self.packed, self.h2, max_action=self.max_action,
            act_dim=self.act_dim, other_dim=self.other_dim)
        other_action = jax.lax.stop_gradient(other_action)   # mirrors .detach()

        # i == 0 bootstrap: (2 * rand - 1) * max_action, exactly as in the PyTorch spec.
        boot_action = (2.0 * jax.random.uniform(rand_key, (self.boot_dim,), jnp.float32)
                       - 1.0) * self.max_action

        all_actions = []
        action = None
        for i in range(self.level_k + 1):
            if i == 0:
                action = boot_action
            elif self.level_k % 2 == 0:
                action = other_action if i % 2 == 1 else self_action
            else:
                action = self_action if i % 2 == 1 else other_action
            all_actions.append(action)
        return action, all_actions


# ---------------------------------- main ------------------------------------ #
if __name__ == "__main__":
    key = jax.random.PRNGKey(0)
    k_obs, k_params, k_rand = jax.random.split(key, 3)

    batch = 8
    obs_dim = 16      # args.obs_shape[agent_id]
    act_dim = 8       # args.action_shape[agent_id]
    level_k = 2       # args.level_k (even branch)
    n_agents = 2      # args.n_agents
    max_action = 1.0  # args.high_action

    actor = LevelKActorPallas(obs_dim=obs_dim, act_dim=act_dim, level_k=level_k,
                              n_agents=n_agents, max_action=max_action, key=k_params)

    o = jax.random.normal(k_obs, (batch, obs_dim), jnp.float32)

    action, all_actions = actor.forward(o, k_rand)
    action = jax.block_until_ready(action)
    for a in all_actions:
        jax.block_until_ready(a)

    # Shape / range checks mirroring the PyTorch control flow.
    assert action.shape == (batch, act_dim)
    assert len(all_actions) == level_k + 1
    assert all_actions[0].shape == (actor.boot_dim,)
    assert bool(jnp.all(jnp.abs(action) <= max_action + 1e-6))
    assert bool(jnp.all(jnp.abs(all_actions[0]) <= max_action + 1e-6))

    # Pure-JAX f32 reference for each (unfused) policy MLP.
    def mlp_ref(o_, layers):
        (w1, b1), (w2, b2), (w3, b3), (w4, b4) = layers
        h = jax.nn.relu(o_ @ w1 + b1)
        h = jax.nn.relu(h @ w2 + b2)
        h = jax.nn.relu(h @ w3 + b3)
        return max_action * jnp.tanh(h @ w4 + b4)

    ref_self = mlp_ref(o, actor.self_layers)     # final level (even k) = self policy
    ref_other = mlp_ref(o, actor.other_layers)   # level 1 (even k)     = other policy
    assert bool(jnp.allclose(action, ref_self, atol=2e-2, rtol=2e-2))
    assert bool(jnp.allclose(all_actions[1], ref_other, atol=2e-2, rtol=2e-2))

    print("KERNEL_OK")
</pallas_src>

<mosaic_0001>
module attributes {stable_mosaic.version = 11 : i64} {
  func.func @_fused_level_k_kernel(%arg0: i32, %arg1: memref<8x16xf32, #tpu.memory_space<vmem>>, %arg2: memref<16x128xbf16, #tpu.memory_space<vmem>>, %arg3: memref<2x128x128xbf16, #tpu.memory_space<vmem>>, %arg4: memref<128x128xbf16, #tpu.memory_space<vmem>>, %arg5: memref<4x128xf32, #tpu.memory_space<vmem>>, %arg6: memref<8x128xf32, #tpu.memory_space<vmem>>) attributes {dimension_semantics = [#tpu.dimension_semantics<parallel>], iteration_bounds = array<i64: 1>, scalar_prefetch = 0 : i64, scratch_operands = 0 : i64, tpu.core_type = #tpu.core_type<tc>, window_params = [{transform_indices = @transform_0, window_bounds = array<i64: 8, 16>}, {pipeline_mode = #tpu.pipeline_mode<synchronous>, transform_indices = @transform_1, window_bounds = array<i64: 16, 128>}, {pipeline_mode = #tpu.pipeline_mode<synchronous>, transform_indices = @transform_2, window_bounds = array<i64: 2, 128, 128>}, {pipeline_mode = #tpu.pipeline_mode<synchronous>, transform_indices = @transform_3, window_bounds = array<i64: 128, 128>}, {pipeline_mode = #tpu.pipeline_mode<synchronous>, transform_indices = @transform_4, window_bounds = array<i64: 4, 128>}, {transform_indices = @transform_5, window_bounds = array<i64: 8, 128>}]} {
    %c0 = arith.constant 0 : index
    %c0_0 = arith.constant 0 : index
    %0 = vector.load %arg1[%c0, %c0_0] : memref<8x16xf32, #tpu.memory_space<vmem>>, vector<8x16xf32>
    %1 = arith.truncf %0 : vector<8x16xf32> to vector<8x16xbf16>
    %c0_1 = arith.constant 0 : index
    %c0_2 = arith.constant 0 : index
    %2 = vector.load %arg2[%c0_1, %c0_2] : memref<16x128xbf16, #tpu.memory_space<vmem>>, vector<16x128xbf16>
    %cst = arith.constant dense<0.000000e+00> : vector<8x128xf32>
    %3 = tpu.matmul %1, %2, %cst {dimension_numbers = #tpu.dot_dimension_numbers<[1], [0], [0], [1], [0, 0, 1, 1], [], []>} : vector<8x16xbf16>, vector<16x128xbf16>, vector<8x128xf32> -> vector<8x128xf32>
    %c0_3 = arith.constant 0 : index
    %c0_4 = arith.constant 0 : index
    %4 = vector.load %arg5[%c0_3, %c0_4] : memref<4x128xf32, #tpu.memory_space<vmem>>, vector<1x128xf32>
    %5 = vector.broadcast %4 : vector<1x128xf32> to vector<8x128xf32>
    %6 = arith.addf %3, %5 : vector<8x128xf32>
    %cst_5 = arith.constant 0.000000e+00 : f32
    %7 = vector.broadcast %cst_5 : f32 to vector<8x128xf32>
    %8 = arith.maximumf %6, %7 : vector<8x128xf32>
    %9 = arith.truncf %8 : vector<8x128xf32> to vector<8x128xbf16>
    %c0_6 = arith.constant 0 : index
    %c0_7 = arith.constant 0 : index
    %c0_8 = arith.constant 0 : index
    %10 = vector.load %arg3[%c0_6, %c0_7, %c0_8] : memref<2x128x128xbf16, #tpu.memory_space<vmem>>, vector<1x128x128xbf16>
    %11 = vector.shape_cast %10 : vector<1x128x128xbf16> to vector<128x128xbf16>
    %cst_9 = arith.constant dense<0.000000e+00> : vector<8x128xf32>
    %12 = tpu.matmul %9, %11, %cst_9 {dimension_numbers = #tpu.dot_dimension_numbers<[1], [0], [0], [1], [0, 0, 1, 1], [], []>} : vector<8x128xbf16>, vector<128x128xbf16>, vector<8x128xf32> -> vector<8x128xf32>
    %c1 = arith.constant 1 : index
    %c0_10 = arith.constant 0 : index
    %13 = vector.load %arg5[%c1, %c0_10] : memref<4x128xf32, #tpu.memory_space<vmem>>, vector<1x128xf32>
    %14 = vector.broadcast %13 : vector<1x128xf32> to vector<8x128xf32>
    %15 = arith.addf %12, %14 : vector<8x128xf32>
    %cst_11 = arith.constant 0.000000e+00 : f32
    %16 = vector.broadcast %cst_11 : f32 to vector<8x128xf32>
    %17 = arith.maximumf %15, %16 : vector<8x128xf32>
    %18 = arith.truncf %17 : vector<8x128xf32> to vector<8x128xbf16>
    %c1_12 = arith.constant 1 : index
    %c0_13 = arith.constant 0 : index
    %c0_14 = arith.constant 0 : index
    %19 = vector.load %arg3[%c1_12, %c0_13, %c0_14] : memref<2x128x128xbf16, #tpu.memory_space<vmem>>, vector<1x128x128xbf16>
    %20 = vector.shape_cast %19 : vector<1x128x128xbf16> to vector<128x128xbf16>
    %cst_15 = arith.constant dense<0.000000e+00> : vector<8x128xf32>
    %21 = tpu.matmul %18, %20, %cst_15 {dimension_numbers = #tpu.dot_dimension_numbers<[1], [0], [0], [1], [0, 0, 1, 1], [], []>} : vector<8x128xbf16>, vector<128x128xbf16>, vector<8x128xf32> -> vector<8x128xf32>
    %c2 = arith.constant 2 : index
    %c0_16 = arith.constant 0 : index
    %22 = vector.load %arg5[%c2, %c0_16] : memref<4x128xf32, #tpu.memory_space<vmem>>, vector<1x128xf32>
    %23 = vector.broadcast %22 : vector<1x128xf32> to vector<8x128xf32>
    %24 = arith.addf %21, %23 : vector<8x128xf32>
    %cst_17 = arith.constant 0.000000e+00 : f32
    %25 = vector.broadcast %cst_17 : f32 to vector<8x128xf32>
    %26 = arith.maximumf %24, %25 : vector<8x128xf32>
    %27 = arith.truncf %26 : vector<8x128xf32> to vector<8x128xbf16>
    %c0_18 = arith.constant 0 : index
    %c0_19 = arith.constant 0 : index
    %28 = vector.load %arg4[%c0_18, %c0_19] : memref<128x128xbf16, #tpu.memory_space<vmem>>, vector<128x128xbf16>
    %cst_20 = arith.constant dense<0.000000e+00> : vector<8x128xf32>
    %29 = tpu.matmul %27, %28, %cst_20 {dimension_numbers = #tpu.dot_dimension_numbers<[1], [0], [0], [1], [0, 0, 1, 1], [], []>} : vector<8x128xbf16>, vector<128x128xbf16>, vector<8x128xf32> -> vector<8x128xf32>
    %c3 = arith.constant 3 : index
    %c0_21 = arith.constant 0 : index
    %30 = vector.load %arg5[%c3, %c0_21] : memref<4x128xf32, #tpu.memory_space<vmem>>, vector<1x128xf32>
    %31 = vector.broadcast %30 : vector<1x128xf32> to vector<8x128xf32>
    %32 = arith.addf %29, %31 : vector<8x128xf32>
    %33 = math.tanh %32 : vector<8x128xf32>
    %cst_22 = arith.constant 1.000000e+00 : f32
    %34 = vector.broadcast %cst_22 : f32 to vector<8x128xf32>
    %35 = arith.mulf %34, %33 : vector<8x128xf32>
    %c0_23 = arith.constant 0 : index
    %c0_24 = arith.constant 0 : index
    %36 = vector.load %arg6[%c0_23, %c0_24] : memref<8x128xf32, #tpu.memory_space<vmem>>, vector<8x128xf32>
    tpu.vector_store %arg6[%c0_23, %c0_24], %35 {strides = array<i32>} : memref<8x128xf32, #tpu.memory_space<vmem>>, vector<8x128xf32>,
    return
  }
  func.func @transform_0(%arg0: i32) -> (i32, i32) {
    %c0_i32 = arith.constant 0 : i32
    %c0_i32_0 = arith.constant 0 : i32
    return %arg0, %c0_i32 : i32, i32
  }
  func.func @transform_1(%arg0: i32) -> (i32, i32) {
    %c0_i32 = arith.constant 0 : i32
    %c0_i32_0 = arith.constant 0 : i32
    %c0_i32_1 = arith.constant 0 : i32
    return %c0_i32, %c0_i32_0 : i32, i32
  }
  func.func @transform_2(%arg0: i32) -> (i32, i32, i32) {
    %c0_i32 = arith.constant 0 : i32
    %c0_i32_0 = arith.constant 0 : i32
    %c0_i32_1 = arith.constant 0 : i32
    %c0_i32_2 = arith.constant 0 : i32
    return %c0_i32, %c0_i32_0, %c0_i32_1 : i32, i32, i32
  }
  func.func @transform_3(%arg0: i32) -> (i32, i32) {
    %c0_i32 = arith.constant 0 : i32
    %c0_i32_0 = arith.constant 0 : i32
    %c0_i32_1 = arith.constant 0 : i32
    return %c0_i32, %c0_i32_0 : i32, i32
  }
  func.func @transform_4(%arg0: i32) -> (i32, i32) {
    %c0_i32 = arith.constant 0 : i32
    %c0_i32_0 = arith.constant 0 : i32
    %c0_i32_1 = arith.constant 0 : i32
    return %c0_i32, %c0_i32_0 : i32, i32
  }
  func.func @transform_5(%arg0: i32) -> (i32, i32) {
    %c0_i32 = arith.constant 0 : i32
    %c0_i32_0 = arith.constant 0 : i32
    return %arg0, %c0_i32 : i32, i32
  }
}

</mosaic_0001>

<bundles_post_ra>
// kernel: tpu_custom_call.1
= control target key start
LH: loop header
LB: loop body
LE: loop exit
PB: predicated region body
PF: predicated region fallthrough
CT: control target
= control target key end

     0   :  { %10 = vsyncpa [#allocation3], 0  ;;  %s864_s0 = inlined_call_operand.hbm [shape: f32[8,16], index: 0, kind: input, shape index: {}]   ;;  %s865_s1 = inlined_call_operand.hbm [shape: bf16[16,128], index: 1, kind: input, shape index: {}]   ;;  %s866_s2 = inlined_call_operand.hbm [shape: bf16[2,128,128], index: 2, kind: input, shape index: {}]   ;;  %s867_s3 = inlined_call_operand.hbm [shape: bf16[128,128], index: 3, kind: input, shape index: {}]   ;;  %s868_s4 = inlined_call_operand.vmem [shape: f32[4,128], index: 4, kind: input, shape index: {}]   ;;  %s869_s5 = inlined_call_operand.hbm [shape: f32[8,128], index: 5, kind: output, shape index: {}]  }
   0x1   :  { %11 = vsyncpa [#allocation6], 0 }
   0x2   :  { %12 = vsyncpa [#allocation9], 0 }
   0x3   :  { %13 = vsyncpa [#allocation4], 0  ;;  %s756_s18 = smov [#allocation5]  }
   0x4   :  { %s29_s19 = sshll.u32 %s756_s18, 4  ;;  %s30_s19 = int_to_ptr.vmem [resolvable:$true] %s29_s19 }
   0x5   :  { %s656_s20 = scalar_lea.vmem %s30_s19, 128  ;;  %p661_p1 = scmp.lt.s32.totalorder %s30_s19, %s30_s19 }
   0x6   :  { %p657_p0 = scmp.ne.s32.totalorder %s30_s19, %s656_s20  ;;  %p662_p2 = scmp.lt.s32.totalorder %s656_s20, %s656_s20 }
   0x8   :  { %p663_p3 = por %p662_p2, %p661_p1 }
   0xa   :  { %p664_p4 = pnand %p663_p3, %p657_p0 }
   0xc   :  { %667 = shalt.err (!%p664_p4)
}
   0xd   :  { %s757_s21 = smov 64   ;;  %s758_s22 = smov 4  }
   0xe   :  { %35 = dma.hbm_to_vmem [thread:$0]  %s865_s1, 128, %s30_s19, [#allocation6], %s757_s21, %s757_s21, %s758_s22  }
   0xf   :  { %s759_s25 = smov [#allocation2]   ;;  %s760_s27 = smov [#allocation7]  }
  0x10   :  { %s20_s26 = sshll.u32 %s759_s25, 4  ;;  %s41_s28 = sshll.u32 %s760_s27, 4  ;;  %s21_s26 = int_to_ptr.vmem [resolvable:$true] %s20_s26  ;;  %s42_s28 = int_to_ptr.vmem [resolvable:$true] %s41_s28 }
  0x11   :  { %s676_s29 = scalar_lea.vmem %s21_s26, 128  ;;  %p681_p6 = scmp.lt.s32.totalorder %s21_s26, %s21_s26 }
  0x12   :  { %p677_p5 = scmp.ne.s32.totalorder %s21_s26, %s676_s29  ;;  %p682_p7 = scmp.lt.s32.totalorder %s676_s29, %s676_s29 }
  0x14   :  { %p683_p8 = por %p682_p7, %p681_p6 }
  0x16   :  { %p684_p9 = pnand %p683_p8, %p677_p5 }
  0x18   :  { %687 = shalt.err (!%p684_p9)
}
  0x19   :  { %23 = dma.hbm_to_vmem [thread:$0]  %s864_s0, 128, %s21_s26, [#allocation3]  }
  0x1a   :  { %s696_s7 = scalar_lea.vmem %s42_s28, 2048  ;;  %p701_p11 = scmp.lt.s32.totalorder %s42_s28, %s42_s28 }
  0x1b   :  { %p697_p10 = scmp.ne.s32.totalorder %s42_s28, %s696_s7  ;;  %p702_p12 = scmp.lt.s32.totalorder %s696_s7, %s696_s7 }
  0x1d   :  { %p703_p13 = por %p702_p12, %p701_p11 }
  0x1f   :  { %p704_p0 = pnand %p703_p13, %p697_p10 }
  0x21   :  { %707 = shalt.err (!%p704_p0)
}
  0x22   :  { %47 = dma.hbm_to_vmem [thread:$0]  %s866_s2, 2048, %s42_s28, [#allocation6], %s757_s21, %s757_s21, %s758_s22  }
  0x23   :  { %s761_s9 = smov [#allocation8]  }
  0x24   :  { %s53_s10 = sshll.u32 %s761_s9, 4  ;;  %s54_s10 = int_to_ptr.vmem [resolvable:$true] %s53_s10 }
  0x25   :  { %s716_s11 = scalar_lea.vmem %s54_s10, 1024  ;;  %p721_p2 = scmp.lt.s32.totalorder %s54_s10, %s54_s10 }
  0x26   :  { %p717_p1 = scmp.ne.s32.totalorder %s54_s10, %s716_s11  ;;  %p722_p3 = scmp.lt.s32.totalorder %s716_s11, %s716_s11 }
  0x28   :  { %p723_p4 = por %p722_p3, %p721_p2 }
  0x2a   :  { %p724_p5 = pnand %p723_p4, %p717_p1 }
  0x2c   :  { %727 = shalt.err (!%p724_p5)
}
  0x2d   :  { %59 = dma.hbm_to_vmem [thread:$0]  %s867_s3, 1024, %s54_s10, [#allocation9], %s757_s21, %s757_s21, %s758_s22  }
  0x2e   :  { %748 = dma.done.wait [#allocation3], 128  }
  0x2f   :  { %749 = vsyncadd [#allocation3], 4294967168 }
  0x30   :  { %750 = dma.done.wait [#allocation6], 2176  }
  0x31   :  { %751 = vsyncadd [#allocation6], 4294965120 }
  0x32   :  { %752 = dma.done.wait [#allocation9], 1024  }
  0x33   :  { %753 = vsyncadd [#allocation9], 4294966272  ;;  %v762_v0 = vmov 0.0   ;;  %vm763_vm0 = vmmov 0   ;;  %v621_v1 = vld [vmem:[#allocation5] sm:$0xff]   ;;  %v75_v2 = vld [vmem:[#allocation2] sm:$0xff] }
  0x34   :  { %546 = vmatprep.subr.bf16.mxu0 %v762_v0  ;;  %548 = vmatprep.mubr.msk.bf16.mxu0 %vm763_vm0, %v762_v0  ;;  %v76_v3 = vpack.c.bf16 %v75_v2, %v75_v2  ;;  %vm90_vm1 = vcmask 130048   ;;  %v622_v4 = vld [vmem:[#allocation7 + $0x38] sm:$0xff]   ;;  %v623_v5 = vld [vmem:[#allocation7 + $0x30] sm:$0xff]   ;;  %v624_v6 = vld [vmem:[#allocation7 + $0x28] sm:$0xff]   ;;  %s764_s19 = smov [#allocation10]  }
  0x35   :  { %552 = vmatprep.subr.bf16.mxu1 %v762_v0  ;;  %568 = vmatprep.mubr.msk.bf16.mxu1 %vm763_vm0, %v762_v0  ;;  %v625_v7 = vld [vmem:[#allocation7 + $0x20] sm:$0xff]   ;;  %v626_v8 = vld [vmem:[#allocation7 + $0x18] sm:$0xff]   ;;  %v627_v9 = vld [vmem:[#allocation7 + $0x10] sm:$0xff]   ;;  %s476_s20 = sshll.u32 %s764_s19, 4  ;;  %s477_s20 = int_to_ptr.vmem [resolvable:$true] %s476_s20 }
  0x36   :  { %547 = vmatpush3.bf16.msra.mxu0 %v621_v1  ;;  %553 = vmatpush3.bf16.msra.mxu1 %v622_v4  ;;  %v628_v10 = vld [vmem:[#allocation7 + $0x8] sm:$0xff]   ;;  %v629_v11 = vld [vmem:[#allocation7] sm:$0xff]   ;;  %v630_v12 = vld [vmem:[#allocation7 + $0x78] sm:$0xff]   ;;  %s728_s21 = scalar_lea.vmem %s477_s20, 128  ;;  %p733_p7 = scmp.lt.s32.totalorder %s477_s20, %s477_s20 }
  0x37   :  { %572 = vmatprep.subr.bf16.mxu0 %v762_v0  ;;  %554 = vmatprep.subr.bf16.mxu1 %v762_v0  ;;  %v631_v13 = vld [vmem:[#allocation7 + $0x70] sm:$0xff]   ;;  %v632_v14 = vld [vmem:[#allocation7 + $0x68] sm:$0xff]   ;;  %v633_v15 = vld [vmem:[#allocation7 + $0x60] sm:$0xff]   ;;  %p729_p6 = scmp.ne.s32.totalorder %s477_s20, %s728_s21  ;;  %p734_p8 = scmp.lt.s32.totalorder %s728_s21, %s728_s21 }
  0x38   :  { %v634_v16 = vld [vmem:[#allocation7 + $0x58] sm:$0xff]   ;;  %v635_v17 = vld [vmem:[#allocation7 + $0x50] sm:$0xff]   ;;  %v636_v26 = vld [vmem:[#allocation7 + $0x48] sm:$0xff]  }
  0x39   :  { %549 = vmatmul.mubr.msk.bf16.vlgmr.msra.gmra.mxu0 %vm90_vm1, %v76_v3  ;;  %v487_v18 = vld [vmem:[%s868_s4] ss:$0 sm:$0xff]  ;;  %v637_v27 = vld [vmem:[#allocation7 + $0x40] sm:$0xff]   ;;  %v638_v28 = vld [vmem:[#allocation8 + $0x38] sm:$0xff]   ;;  %p735_p9 = por %p734_p8, %p733_p7 }
  0x3a   :  { %588 = vmatprep.mubr.msk.bf16.mxu0 %vm763_vm0, %v762_v0  ;;  %555 = vmatpush3.bf16.msra.mxu1 %v623_v5  ;;  %v639_v29 = vld [vmem:[#allocation8 + $0x30] sm:$0xff]   ;;  %v640_v30 = vld [vmem:[#allocation8 + $0x28] sm:$0xff]   ;;  %v641_v31 = vld [vmem:[#allocation8 + $0x20] sm:$0xff]  }
  0x3b   :  { %556 = vmatprep.subr.bf16.mxu1 %v762_v0  ;;  %573 = vmatpush3.bf16.msra.mxu0 %v630_v12  ;;  %v642_v32 = vld [vmem:[#allocation8 + $0x18] sm:$0xff]   ;;  %v643_v33 = vld [vmem:[#allocation8 + $0x10] sm:$0xff]   ;;  %v644_v42 = vld [vmem:[#allocation8 + $0x8] sm:$0xff]   ;;  %p736_p10 = pnand %p735_p9, %p729_p6 }
  0x3c   :  { %574 = vmatprep.subr.bf16.mxu0 %v762_v0  ;;  %v490_v34 = vld [vmem:[%s868_s4 + $0x1] ss:$0 sm:$0xff]  ;;  %v645_v43 = vld [vmem:[#allocation8] sm:$0xff]   ;;  %v499_v44 = vld [vmem:[%s868_s4 + $0x2] ss:$0 sm:$0xff] }
  0x3d   :  { %v508_v52 = vld [vmem:[%s868_s4 + $0x3] ss:$0 sm:$0xff] }
  0x3e   :  { %557 = vmatpush3.bf16.msra.mxu1 %v624_v6 }
  0x3f   :  { %558 = vmatprep.subr.bf16.mxu1 %v762_v0  ;;  %575 = vmatpush3.bf16.msra.mxu0 %v631_v13 }
  0x40   :  { %576 = vmatprep.subr.bf16.mxu0 %v762_v0 }
  0x42   :  { %559 = vmatpush3.bf16.msra.mxu1 %v625_v7 }
  0x43   :  { %560 = vmatprep.subr.bf16.mxu1 %v762_v0  ;;  %577 = vmatpush3.bf16.msra.mxu0 %v632_v14 }
  0x44   :  { %578 = vmatprep.subr.bf16.mxu0 %v762_v0 }
  0x46   :  { %561 = vmatpush3.bf16.msra.mxu1 %v626_v8 }
  0x47   :  { %562 = vmatprep.subr.bf16.mxu1 %v762_v0  ;;  %579 = vmatpush3.bf16.msra.mxu0 %v633_v15 }
  0x48   :  { %580 = vmatprep.subr.bf16.mxu0 %v762_v0 }
  0x4a   :  { %563 = vmatpush3.bf16.msra.mxu1 %v627_v9 }
  0x4b   :  { %564 = vmatprep.subr.bf16.mxu1 %v762_v0  ;;  %581 = vmatpush3.bf16.msra.mxu0 %v634_v16 }
  0x4c   :  { %582 = vmatprep.subr.bf16.mxu0 %v762_v0 }
  0x4e   :  { %565 = vmatpush3.bf16.msra.mxu1 %v628_v10 }
  0x4f   :  { %566 = vmatprep.subr.bf16.mxu1 %v762_v0  ;;  %583 = vmatpush3.bf16.msra.mxu0 %v635_v17 }
  0x50   :  { %584 = vmatprep.subr.bf16.mxu0 %v762_v0 }
  0x52   :  { %567 = vmatpush3.bf16.msra.mxu1 %v629_v11 }
  0x53   :  { %592 = vmatprep.subr.bf16.mxu1 %v762_v0  ;;  %585 = vmatpush3.bf16.msra.mxu0 %v636_v26 }
  0x54   :  { %586 = vmatprep.subr.bf16.mxu0 %v762_v0 }
  0x57   :  { %587 = vmatpush3.bf16.msra.mxu0 %v637_v27 }
  0xf9   :  { %v128_v19 = vpop.f32.mrf.mxu0 }
  0xfa   :  { %v129_v20 = vadd.f32 %v487_v18, %v128_v19 }
  0xfb   :  { %v550_v21 = vpop.f32.mrf.mxu0 }
  0xfc   :  { %v134_v22 = vmax.f32 %v129_v20, 0.0 }
  0xfd   :  { %v131_v23 = vpop.f32.mrf.mxu0 }
  0xfe   :  { %v135_v24 = vpack.c.bf16 %v134_v22, %v134_v22 }
  0xff   :  { %v551_v25 = vpop.f32.mrf.mxu0 }
 0x100   :  { %569 = vmatmul.mubr.bf16.vlgmr.msra.gmra.mxu1 %v135_v24 }
 0x101   :  { %608 = vmatprep.mubr.msk.bf16.mxu1 %vm763_vm0, %v762_v0  ;;  %593 = vmatpush3.bf16.msra.mxu1 %v638_v28 }
 0x102   :  { %594 = vmatprep.subr.bf16.mxu1 %v762_v0 }
 0x105   :  { %595 = vmatpush3.bf16.msra.mxu1 %v639_v29 }
 0x106   :  { %596 = vmatprep.subr.bf16.mxu1 %v762_v0 }
 0x109   :  { %597 = vmatpush3.bf16.msra.mxu1 %v640_v30 }
 0x10a   :  { %598 = vmatprep.subr.bf16.mxu1 %v762_v0 }
 0x10d   :  { %599 = vmatpush3.bf16.msra.mxu1 %v641_v31 }
 0x10e   :  { %600 = vmatprep.subr.bf16.mxu1 %v762_v0 }
 0x111   :  { %601 = vmatpush3.bf16.msra.mxu1 %v642_v32 }
 0x112   :  { %602 = vmatprep.subr.bf16.mxu1 %v762_v0 }
 0x115   :  { %603 = vmatpush3.bf16.msra.mxu1 %v643_v33 }
 0x116   :  { %604 = vmatprep.subr.bf16.mxu1 %v762_v0 }
 0x119   :  { %605 = vmatpush3.bf16.msra.mxu1 %v644_v42 }
 0x11a   :  { %606 = vmatprep.subr.bf16.mxu1 %v762_v0 }
 0x11d   :  { %607 = vmatpush3.bf16.msra.mxu1 %v645_v43 }
 0x1c0   :  { %v239_v35 = vpop.f32.mrf.mxu1 }
 0x1c1   :  { %v240_v36 = vadd.f32 %v490_v34, %v239_v35 }
 0x1c2   :  { %v570_v37 = vpop.f32.mrf.mxu1 }
 0x1c3   :  { %v245_v38 = vmax.f32 %v240_v36, 0.0 }
 0x1c4   :  { %v242_v39 = vpop.f32.mrf.mxu1 }
 0x1c5   :  { %v246_v40 = vpack.c.bf16 %v245_v38, %v245_v38 }
 0x1c6   :  { %v571_v41 = vpop.f32.mrf.mxu1 }
 0x1c7   :  { %589 = vmatmul.mubr.bf16.vlgmr.msra.gmra.mxu0 %v246_v40 }
 0x287   :  { %v351_v45 = vpop.f32.mrf.mxu0 }
 0x288   :  { %v352_v46 = vadd.f32 %v499_v44, %v351_v45 }
 0x289   :  { %v590_v47 = vpop.f32.mrf.mxu0 }
 0x28a   :  { %v357_v48 = vmax.f32 %v352_v46, 0.0 }
 0x28b   :  { %v354_v49 = vpop.f32.mrf.mxu0 }
 0x28c   :  { %v358_v50 = vpack.c.bf16 %v357_v48, %v357_v48 }
 0x28d   :  { %v591_v51 = vpop.f32.mrf.mxu0 }
 0x28e   :  { %609 = vmatmul.mubr.bf16.vlgmr.msra.gmra.mxu1 %v358_v50 }
 0x34e   :  { %v462_v53 = vpop.f32.mrf.mxu1 }
 0x34f   :  { %v463_v54 = vadd.f32 %v508_v52, %v462_v53 }
 0x350   :  { %v610_v55 = vpop.f32.mrf.mxu1 }
 0x351   :  { %646 = vtanh.f32 %v463_v54 }
 0x352   :  { %v465_v56 = vpop.f32.mrf.mxu1 }
 0x354   :  { %v611_v57 = vpop.f32.mrf.mxu1 }
 0x35e   :  { %v647_v58 = vpop.eup %646 }
 0x35f   :  { %469 = vst [vmem:[#allocation10] sm:$0xff] %v647_v58 }
 0x360   :  { %739 = shalt.err (!%p736_p10)
}
 0x361   :  { %479 = dma.vmem_to_hbm [thread:$0]  %s477_s20, 128, %s869_s5, [#allocation4]  }
 0x362   :  { %754 = dma.done.wait [#allocation4], 128  }
 0x363   :  { %755 = vsyncadd [#allocation4], 4294967168 }
 0x364   :  { %483 = vsyncpa [#allocation3], 1 }
 0x365   :  { %484 = vsyncpa [#allocation6], 1 }
 0x366   :  { %485 = vsyncpa [#allocation9], 1 }
 0x367   :  { %486 = vsyncpa [#allocation4], 1 }

</bundles_post_ra>
